<compile_context>
chip_gen: v7x
topology: tpu7x:2x2x1
jax: 0.10.0
libtpu: 0.0.40
codegen_flags: <defaults>
</compile_context>

<pallas_src>
import functools

import jax
import jax.numpy as jnp
from jax import lax
from jax.experimental import pallas as pl
from jax.experimental.pallas import tpu as pltpu


def _choose_token_tile(n, cap=128):
    """Largest legal token tile: full extent if small, else a multiple of 8
    that divides n, else fall back to the full extent (always legal)."""
    if n <= cap:
        return n
    for t in range(cap, 7, -1):
        if t % 8 == 0 and n % t == 0:
            return t
    return n


# ---------------------------------------------------------------------------
# Kernel 1: Fp32LayerNorm over a dense (tile, D) activation block.
# Used for the query-embedding half (no gather needed).
# ---------------------------------------------------------------------------
def _layernorm_kernel(x_ref, gamma_ref, beta_ref, out_ref, *, eps):
    x = x_ref[...].astype(jnp.float32)                       # (tile, D)
    mean = jnp.mean(x, axis=-1, keepdims=True)
    var = jnp.mean(jnp.square(x - mean), axis=-1, keepdims=True)
    y = (x - mean) * lax.rsqrt(var + eps)
    y = y * gamma_ref[...] + beta_ref[...]                    # (1, D) broadcast
    out_ref[...] = y.astype(out_ref.dtype)


def _layernorm(x, gamma_f32, beta_f32, *, eps, out_dtype):
    B, N, D = x.shape
    tile = _choose_token_tile(N)
    grid = (B, N // tile)
    return pl.pallas_call(
        functools.partial(_layernorm_kernel, eps=eps),
        out_shape=jax.ShapeDtypeStruct((B, N, D), out_dtype),
        grid_spec=pltpu.PrefetchScalarGridSpec(
            num_scalar_prefetch=0,
            grid=grid,
            in_specs=[
                pl.BlockSpec((None, tile, D), lambda b, j: (b, j, 0)),
                pl.BlockSpec((1, D), lambda b, j: (0, 0)),
                pl.BlockSpec((1, D), lambda b, j: (0, 0)),
            ],
            out_specs=pl.BlockSpec((None, tile, D), lambda b, j: (b, j, 0)),
        ),
        compiler_params=pltpu.CompilerParams(
            dimension_semantics=("parallel", "parallel"),
            vmem_limit_bytes=32 * 1024 * 1024),
    )(x, gamma_f32, beta_f32)


# ---------------------------------------------------------------------------
# Kernel 2: text-token path.
#   - input_ids / position_ids scalar-prefetched into SMEM
#   - token / position tables resident in VMEM (constant index_map)
#   - gather `tile` rows into a float32 VMEM scratch, then vectorized LayerNorm
# ---------------------------------------------------------------------------
def _text_embed_kernel(ids_ref, pos_ids_ref,              # SMEM scalar prefetch (B, T)
                       tok_tab_ref, pos_tab_ref,          # full tables in VMEM
                       gamma_ref, beta_ref,               # (1, D) float32
                       out_ref,                           # (tile, D) output block
                       emb_ref,                           # (tile, D) f32 scratch
                       *, tile, eps):
    b = pl.program_id(0)
    j = pl.program_id(1)
    base = j * tile

    def gather_row(i, carry):
        tid = ids_ref[b, base + i]
        pid = pos_ids_ref[b, base + i]
        row = (tok_tab_ref[pl.ds(tid, 1), :].astype(jnp.float32)
               + pos_tab_ref[pl.ds(pid, 1), :].astype(jnp.float32))
        emb_ref[pl.ds(i, 1), :] = row
        return carry

    lax.fori_loop(0, tile, gather_row, 0, unroll=True)

    x = emb_ref[...]                                        # (tile, D) float32
    mean = jnp.mean(x, axis=-1, keepdims=True)
    var = jnp.mean(jnp.square(x - mean), axis=-1, keepdims=True)
    y = (x - mean) * lax.rsqrt(var + eps)
    y = y * gamma_ref[...] + beta_ref[...]
    out_ref[...] = y.astype(out_ref.dtype)


def _text_embed(input_ids, position_ids, token_table, position_table,
                gamma_f32, beta_f32, *, eps, out_dtype):
    B, T = input_ids.shape
    VOCAB, D = token_table.shape
    MAXPOS = position_table.shape[0]
    tile = _choose_token_tile(T)
    grid = (B, T // tile)

    kernel = functools.partial(_text_embed_kernel, tile=tile, eps=eps)

    return pl.pallas_call(
        kernel,
        out_shape=jax.ShapeDtypeStruct((B, T, D), out_dtype),
        grid_spec=pltpu.PrefetchScalarGridSpec(
            num_scalar_prefetch=2,
            grid=grid,
            in_specs=[
                # Full tables, constant block index -> fetched once, kept resident.
                pl.BlockSpec((VOCAB, D), lambda b, j, ids, pids: (0, 0)),
                pl.BlockSpec((MAXPOS, D), lambda b, j, ids, pids: (0, 0)),
                pl.BlockSpec((1, D), lambda b, j, ids, pids: (0, 0)),
                pl.BlockSpec((1, D), lambda b, j, ids, pids: (0, 0)),
            ],
            out_specs=pl.BlockSpec((None, tile, D),
                                   lambda b, j, ids, pids: (b, j, 0)),
            scratch_shapes=[pltpu.VMEM((tile, D), jnp.float32)],
        ),
        compiler_params=pltpu.CompilerParams(
            dimension_semantics=("parallel", "parallel"),
            vmem_limit_bytes=32 * 1024 * 1024),
    )(input_ids, position_ids, token_table, position_table, gamma_f32, beta_f32)


# ---------------------------------------------------------------------------
# Wrapper mirroring QformerEmbedding.forward
# ---------------------------------------------------------------------------
def qformer_embedding(input_ids=None, query_embeddings=None, *,
                      token_table, position_table, gamma, beta,
                      position_ids=None, past_seq_length=0, eps=1e-12):
    if input_ids is None and query_embeddings is None:
        raise ValueError("Either input_ids or query_embeddings must be passed.")

    D = gamma.shape[-1]
    gamma_f32 = gamma.astype(jnp.float32).reshape(1, D)
    beta_f32 = beta.astype(jnp.float32).reshape(1, D)
    out_dtype = (query_embeddings.dtype if query_embeddings is not None
                 else token_table.dtype)

    parts = []
    if query_embeddings is not None:
        parts.append(_layernorm(query_embeddings, gamma_f32, beta_f32,
                                eps=eps, out_dtype=out_dtype))
    if input_ids is not None:
        B, T = input_ids.shape
        if position_ids is None:
            position_ids = jnp.broadcast_to(
                jnp.arange(past_seq_length, past_seq_length + T,
                           dtype=jnp.int32)[None, :], (B, T))
        parts.append(_text_embed(input_ids.astype(jnp.int32),
                                 position_ids.astype(jnp.int32),
                                 token_table, position_table,
                                 gamma_f32, beta_f32,
                                 eps=eps, out_dtype=out_dtype))
    if len(parts) == 1:
        return parts[0]
    return jnp.concatenate(parts, axis=1)   # torch.cat along the token dim


# ---------------------------------------------------------------------------
# Pure-JAX reference
# ---------------------------------------------------------------------------
def _reference(input_ids, query_embeddings, token_table, position_table,
               gamma, beta, eps=1e-12, past_seq_length=0):
    pieces = []
    if query_embeddings is not None:
        pieces.append(query_embeddings)
    if input_ids is not None:
        T = input_ids.shape[1]
        pos_ids = jnp.arange(past_seq_length, past_seq_length + T)
        word = token_table[input_ids]                  # (B, T, D)
        pos = position_table[pos_ids][None, :, :]      # (1, T, D)
        pieces.append(word + pos)
    emb = pieces[0] if len(pieces) == 1 else jnp.concatenate(pieces, axis=1)
    x = emb.astype(jnp.float32)
    mean = x.mean(-1, keepdims=True)
    var = ((x - mean) ** 2).mean(-1, keepdims=True)
    y = (x - mean) * lax.rsqrt(var + eps)
    y = y * gamma.astype(jnp.float32) + beta.astype(jnp.float32)
    return y.astype(emb.dtype)


if __name__ == "__main__":
    B, T, NQ, D = 2, 8, 4, 128
    VOCAB, MAX_POS, PAD_ID = 32, 16, 0
    EPS = 1e-12

    key = jax.random.PRNGKey(0)
    k_tok, k_pos, k_q, k_ids, k_g, k_b = jax.random.split(key, 6)

    # Parameters. padding_idx row is zeroed, matching nn.Embedding(padding_idx=0).
    token_table = jax.random.normal(k_tok, (VOCAB, D), dtype=jnp.float32) * 0.02
    token_table = token_table.at[PAD_ID].set(0.0)
    position_table = jax.random.normal(k_pos, (MAX_POS, D), dtype=jnp.float32) * 0.02
    gamma = 1.0 + 0.1 * jax.random.normal(k_g, (D,), dtype=jnp.float32)
    beta = 0.05 * jax.random.normal(k_b, (D,), dtype=jnp.float32)

    input_ids = jax.random.randint(k_ids, (B, T), 0, VOCAB, dtype=jnp.int32)
    input_ids = input_ids.at[:, -1].set(PAD_ID)     # exercise the padding row
    query_embeddings = jax.random.normal(k_q, (B, NQ, D), dtype=jnp.float32)

    # Concatenation path (query + text).
    out = qformer_embedding(input_ids=input_ids, query_embeddings=query_embeddings,
                            token_table=token_table, position_table=position_table,
                            gamma=gamma, beta=beta, eps=EPS)
    out = jax.block_until_ready(out)
    ref = _reference(input_ids, query_embeddings, token_table, position_table,
                     gamma, beta, eps=EPS)
    assert out.shape == (B, NQ + T, D)
    assert jnp.allclose(out, ref, atol=1e-5, rtol=1e-5), "mismatch (both inputs)"

    # Query-only path.
    out_q = jax.block_until_ready(
        qformer_embedding(query_embeddings=query_embeddings,
                          token_table=token_table, position_table=position_table,
                          gamma=gamma, beta=beta, eps=EPS))
    ref_q = _reference(None, query_embeddings, token_table, position_table,
                       gamma, beta, eps=EPS)
    assert jnp.allclose(out_q, ref_q, atol=1e-5, rtol=1e-5), "mismatch (query only)"

    # input_ids-only path.
    out_t = jax.block_until_ready(
        qformer_embedding(input_ids=input_ids,
                          token_table=token_table, position_table=position_table,
                          gamma=gamma, beta=beta, eps=EPS))
    ref_t = _reference(input_ids, None, token_table, position_table,
                       gamma, beta, eps=EPS)
    assert jnp.allclose(out_t, ref_t, atol=1e-5, rtol=1e-5), "mismatch (ids only)"

    print("KERNEL_OK")
</pallas_src>

<mosaic_0001>
module attributes {stable_mosaic.version = 11 : i64} {
  func.func @_layernorm_kernel(%arg0: i32, %arg1: i32, %arg2: memref<1x4x128xf32, #tpu.memory_space<vmem>>, %arg3: memref<1x128xf32, #tpu.memory_space<vmem>>, %arg4: memref<1x128xf32, #tpu.memory_space<vmem>>, %arg5: memref<1x4x128xf32, #tpu.memory_space<vmem>>) attributes {dimension_semantics = [#tpu.dimension_semantics<parallel>, #tpu.dimension_semantics<parallel>], iteration_bounds = array<i64: 2, 1>, scalar_prefetch = 0 : i64, scratch_operands = 0 : i64, tpu.core_type = #tpu.core_type<tc>, window_params = [{transform_indices = @transform_0, window_bounds = array<i64: 1, 4, 128>}, {pipeline_mode = #tpu.pipeline_mode<synchronous>, transform_indices = @transform_1, window_bounds = array<i64: 1, 128>}, {pipeline_mode = #tpu.pipeline_mode<synchronous>, transform_indices = @transform_2, window_bounds = array<i64: 1, 128>}, {transform_indices = @transform_3, window_bounds = array<i64: 1, 4, 128>}]} {
    %c0 = arith.constant 0 : index
    %c0_0 = arith.constant 0 : index
    %c0_1 = arith.constant 0 : index
    %0 = vector.load %arg2[%c0, %c0_0, %c0_1] : memref<1x4x128xf32, #tpu.memory_space<vmem>>, vector<1x4x128xf32>
    %1 = vector.shape_cast %0 : vector<1x4x128xf32> to vector<4x128xf32>
    %cst = arith.constant dense<0.000000e+00> : vector<4xf32>
    %2 = vector.multi_reduction <add>, %1, %cst [1] : vector<4x128xf32> to vector<4xf32>
    %3 = vector.shape_cast %2 : vector<4xf32> to vector<4x1xf32>
    %cst_2 = arith.constant 1.280000e+02 : f32
    %4 = vector.broadcast %cst_2 : f32 to vector<4x1xf32>
    %5 = arith.divf %3, %4 : vector<4x1xf32>
    %6 = vector.broadcast %5 : vector<4x1xf32> to vector<4x128xf32>
    %7 = arith.subf %1, %6 : vector<4x128xf32>
    %8 = arith.mulf %7, %7 : vector<4x128xf32>
    %cst_3 = arith.constant dense<0.000000e+00> : vector<4xf32>
    %9 = vector.multi_reduction <add>, %8, %cst_3 [1] : vector<4x128xf32> to vector<4xf32>
    %10 = vector.shape_cast %9 : vector<4xf32> to vector<4x1xf32>
    %cst_4 = arith.constant 1.280000e+02 : f32
    %11 = vector.broadcast %cst_4 : f32 to vector<4x1xf32>
    %12 = arith.divf %10, %11 : vector<4x1xf32>
    %13 = vector.broadcast %5 : vector<4x1xf32> to vector<4x128xf32>
    %14 = arith.subf %1, %13 : vector<4x128xf32>
    %cst_5 = arith.constant 9.99999996E-13 : f32
    %15 = vector.broadcast %cst_5 : f32 to vector<4x1xf32>
    %16 = arith.addf %12, %15 : vector<4x1xf32>
    %17 = math.rsqrt %16 : vector<4x1xf32>
    %18 = vector.broadcast %17 : vector<4x1xf32> to vector<4x128xf32>
    %19 = arith.mulf %14, %18 : vector<4x128xf32>
    %c0_6 = arith.constant 0 : index
    %c0_7 = arith.constant 0 : index
    %20 = vector.load %arg3[%c0_6, %c0_7] : memref<1x128xf32, #tpu.memory_space<vmem>>, vector<1x128xf32>
    %21 = vector.broadcast %20 : vector<1x128xf32> to vector<4x128xf32>
    %22 = arith.mulf %19, %21 : vector<4x128xf32>
    %c0_8 = arith.constant 0 : index
    %c0_9 = arith.constant 0 : index
    %23 = vector.load %arg4[%c0_8, %c0_9] : memref<1x128xf32, #tpu.memory_space<vmem>>, vector<1x128xf32>
    %24 = vector.broadcast %23 : vector<1x128xf32> to vector<4x128xf32>
    %25 = arith.addf %22, %24 : vector<4x128xf32>
    %c0_10 = arith.constant 0 : index
    %c0_11 = arith.constant 0 : index
    %c0_12 = arith.constant 0 : index
    %26 = vector.load %arg5[%c0_10, %c0_11, %c0_12] : memref<1x4x128xf32, #tpu.memory_space<vmem>>, vector<1x4x128xf32>
    %27 = vector.shape_cast %26 : vector<1x4x128xf32> to vector<4x128xf32>
    %28 = vector.shape_cast %25 : vector<4x128xf32> to vector<1x4x128xf32>
    tpu.vector_store %arg5[%c0_10, %c0_11, %c0_12], %28 {strides = array<i32>} : memref<1x4x128xf32, #tpu.memory_space<vmem>>, vector<1x4x128xf32>,
    return
  }
  func.func @transform_0(%arg0: i32, %arg1: i32) -> (i32, i32, i32) {
    %c0_i32 = arith.constant 0 : i32
    %c0_i32_0 = arith.constant 0 : i32
    return %arg0, %arg1, %c0_i32 : i32, i32, i32
  }
  func.func @transform_1(%arg0: i32, %arg1: i32) -> (i32, i32) {
    %c0_i32 = arith.constant 0 : i32
    %c0_i32_0 = arith.constant 0 : i32
    %c0_i32_1 = arith.constant 0 : i32
    return %c0_i32, %c0_i32_0 : i32, i32
  }
  func.func @transform_2(%arg0: i32, %arg1: i32) -> (i32, i32) {
    %c0_i32 = arith.constant 0 : i32
    %c0_i32_0 = arith.constant 0 : i32
    %c0_i32_1 = arith.constant 0 : i32
    return %c0_i32, %c0_i32_0 : i32, i32
  }
  func.func @transform_3(%arg0: i32, %arg1: i32) -> (i32, i32, i32) {
    %c0_i32 = arith.constant 0 : i32
    %c0_i32_0 = arith.constant 0 : i32
    return %arg0, %arg1, %c0_i32 : i32, i32, i32
  }
}

</mosaic_0001>

<bundles_post_ra>
// kernel: tpu_custom_call.1
= control target key start
LH: loop header
LB: loop body
LE: loop exit
PB: predicated region body
PF: predicated region fallthrough
CT: control target
= control target key end

     0   :  { %8 = vsyncpa [#allocation3], 0  ;;  %s724_s0 = inlined_call_operand.hbm [shape: f32[2,4,128], index: 0, kind: input, shape index: {}]   ;;  %s725_s1 = inlined_call_operand.vmem [shape: f32[1,128], index: 1, kind: input, shape index: {}]   ;;  %s726_s2 = inlined_call_operand.vmem [shape: f32[1,128], index: 2, kind: input, shape index: {}]   ;;  %s727_s3 = inlined_call_operand.hbm [shape: f32[2,4,128], index: 3, kind: output, shape index: {}]  }
   0x1   :  { %10 = vsyncpa [#allocation3 + $0x1], 0 }
   0x2   :  { %11 = vsyncpa [#allocation4], 0 }
   0x3   :  { %13 = vsyncpa [#allocation4 + $0x1], 0  ;;  %s546_s12 = smov 0   ;;  %s548_s13 = smov 0  }
   0x4   :  { %s550_s14 = smov 0   ;;  %s552_s15 = smov 0  }
   0x5   :  { %s554_s16 = smov 0   ;;  %s556_s17 = smov 0  }
   0x6 LB: > { %s331_s18 = sadd.s32 4294967295, %s522_s17   ;;  %s332_s19 = sadd.s32 4294967294, %s522_s17   ;;  %s522_s17 = sphi %s556_s17, %s19_s17   ;;  %s518_s16 = sphi %s554_s16, %s743_s16   ;;  %s514_s15 = sphi %s552_s15, %s742_s15   ;;  %s510_s14 = sphi %s550_s14, %s741_s14   ;;  %s506_s13 = sphi %s548_s13, %s740_s13   ;;  %s502_s12 = sphi %s546_s12, %s739_s12  }
   0x7   : > { %s31_s20 = sadd.s32 1, %s518_s16  ;;  %s40_s21 = sadd.s32 1, %s510_s14 }
   0x8   : > { %p33_p0 = scmp.ge.s32.totalorder %s31_s20, 2  ;;  %p47_p1 = scmp.ne.s32.totalorder %s510_s14, %s506_s13 }
   0x9   : > { %p48_p2 = scmp.eq.s32.totalorder %s522_s17, 0  ;;  %p53_p3 = scmp.ne.s32.totalorder %s506_s13, %s502_s12 }
   0xa   : > { %s745_s20 = smov (%p33_p0, %s31_s20), 0  ;;  %p54_p5 = scmp.eq.s32.totalorder %s331_s18, 0 }
   0xb   : > { %p587_p4 = por %p48_p2, %p47_p1  ;;  %s35_s23 = ssub.s32 %s518_s16, %s745_s20 }
   0xc   : > { %p121_p6 = scmp.eq.s32.totalorder %s331_s18, 1  ;;  %p38_p7 = scmp.eq.s32.totalorder %s35_s23, 0 }
   0xd   : > { %p593_p8 = por %p54_p5, %p53_p3  ;;  %p127_p10 = scmp.eq.s32.totalorder %s332_s19, 1 }
   0xe   : > { %p597_p9 = por %p121_p6, %p47_p1  ;;  %p358_p13 = scmp.lt.s32.totalorder %s522_s17, 2 }
   0xf   : > { %s602_s26 = scalar_select %p38_p7, %s510_s14, %s40_s21  }
  0x10   : > { %s731_s25 = scalar_select %p597_p9, 1, 0 }
  0x11   : > { %p604_p11 = por %p127_p10, %p53_p3  ;;  %s153_s28 = sand.u32 1, %s510_s14  }
  0x12   : > { %s335_s29 = sshll.u32 %s153_s28, 2  ;;  %s336_s30 = sshll.u32 %s518_s16, 6 }
  0x13   : > { %s732_s27 = scalar_select %p604_p11, 1, 0 }
  0x14   : > { %s615_s6 = scalar_lea.hbm %s724_s0, %s336_s30  ;;  %s157_s7 = scalar_lea.vmem [#allocation2], %s335_s29 }
  0x15   : > { %s165_s8 = sshll.u32 %s157_s7, 4  ;;  %p621_p0 = pnand %p358_p13, %p587_p4  ;;  %s617_s8 = int_to_ptr.vmem [resolvable:$true] %s165_s8 }
  0x16   : > { %s154_s10 = scalar_lea.sflag [#allocation3], %s153_s28  ;;  %s410_s11 = scalar_lea.hbm %s615_s6, 64 }
  0x17   : > { %p411_p3 = scmp.ne.s32.totalorder %s615_s6, %s410_s11  ;;  %p412_p5 = pneg %p621_p0 }
  0x18   : > { %s415_s21 = scalar_lea.hbm %s724_s0, 128  ;;  %p416_p4 = scmp.lt.u32.totalorder %s615_s6, %s724_s0 }
  0x19   : > { %p413_p6 = pnand %p412_p5, %p411_p3  ;;  %p417_p10 = scmp.lt.u32.totalorder %s415_s21, %s410_s11 }
  0x1a   : > { %p419_p12 = scmp.lt.u32.totalorder %s410_s11, %s615_s6 }
  0x1b   : > { %p414_p7 = pneg %p413_p6  ;;  %p418_p13 = por %p417_p10, %p416_p4 }
  0x1d   : > { %p420_p1 = por %p419_p12, %p418_p13 }
  0x1f   : > { %p421_p2 = pnand %p420_p1, %p414_p7 }
  0x21   : > { %424 = shalt.err (!%p421_p2)
}
  0x22   : > { %s425_s28 = scalar_lea.vmem %s617_s8, 64  ;;  %s524_s29 = smov [#allocation2]  }
  0x23   : > { %p426_p3 = scmp.ne.s32.totalorder %s617_s8, %s425_s28  ;;  %s430_s30 = sshll.u32 %s524_s29, 4  ;;  %s431_s30 = int_to_ptr.vmem [resolvable:$false] %s430_s30 }
  0x24   : > { %s432_s4 = scalar_lea.vmem %s431_s30, 128  ;;  %p433_p9 = scmp.lt.s32.totalorder %s617_s8, %s431_s30 }
  0x25   : > { %p428_p6 = pnand %p426_p3, %p412_p5  ;;  %p434_p4 = scmp.lt.s32.totalorder %s432_s4, %s425_s28 }
  0x27   : > { %p429_p11 = pneg %p428_p6  ;;  %p435_p10 = por %p434_p4, %p433_p9 }
  0x29   : > { %p436_p12 = pnand %p435_p10, %p429_p11 }
  0x2b   : > { %439 = shalt.err (!%p436_p12)
}
  0x2c   : > { %353 = dma.hbm_to_vmem [thread:$0]  (!%p621_p0), %s615_s6, 64, %s617_s8, %s154_s10  }
  0x2d   : > { %p734_p1 = scmp.lt.s32.totalorder %s522_s17, 3  ;;  %p735_p2 = scmp.ge.s32.totalorder %s522_s17, 1 }
  0x2f   : > { %p171_p5 = pnand %p735_p2, %p734_p1 }
  0x30   : > { %s657_s5 = sand.u32 (!%p171_p5), 1, %s506_s13  }
  0x31   : > { %174 = sbr.rel (%p171_p5) target bundleno = 385 (0x181), region = 32  ;;  %s338_s7 = sshll.u32 (!%p171_p5), %s657_s5, 2 }
  0x32   : > { %s177_s11 = scalar_lea.sflag (!%p171_p5), [#allocation3], %s657_s5  ;;  %s180_s18 = scalar_lea.vmem (!%p171_p5), [#allocation2], %s338_s7 }
  0x38   : > { %493 = dma.done.wait (%p593_p8), %s177_s11, 64  }
  0x39   : > { %495 = vsyncadd (%p593_p8), %s177_s11, 4294967232  ;;  %vm204_vm0 = vcmask 1043456   ;;  %v203_v0 = vld [vmem:[%s180_s18] sm:$0xf]  ;;  %s343_s10 = sshll.u32 %s514_s15, 6  ;;  %s202_s19 = scalar_lea.vmem [#allocation5], %s338_s7 }
  0x3a   : > { %v205_v1 = vsel %vm204_vm0, %v203_v0, 0.0  ;;  %v340_v11 = vld [vmem:[%s725_s1] ss:$0 sm:$0xff]  ;;  %s251_s21 = sshll.u32 %s202_s19, 4  ;;  %s675_s28 = scalar_lea.hbm %s727_s3, %s343_s10  ;;  %s677_s21 = int_to_ptr.vmem [resolvable:$true] %s251_s21 }
  0x3b   : > { %206 = vadd.xlane.f32.xlu0 %v205_v1  ;;  %v341_v13 = vld [vmem:[%s726_s2] ss:$0 sm:$0xff]  ;;  %s237_s29 = scalar_lea.sflag [#allocation4], %s657_s5  ;;  %s440_s30 = scalar_lea.vmem %s677_s21, 64 }
  0x3c   : > { %p441_p8 = scmp.ne.s32.totalorder %s677_s21, %s440_s30  ;;  %p736_p9 = scmp.ne.s32.totalorder %s731_s25, 0 }
  0x3d   : > { %s525_s15 = smov [#allocation5]  }
  0x3e   : > { %p442_p11 = pnand %p441_p8, %p736_p9  ;;  %s444_s4 = sshll.u32 %s525_s15, 4  ;;  %s445_s4 = int_to_ptr.vmem [resolvable:$false] %s444_s4 }
  0x3f   : > { %s446_s7 = scalar_lea.vmem %s445_s4, 128  ;;  %p447_p7 = scmp.lt.s32.totalorder %s677_s21, %s445_s4 }
  0x40   : > { %p443_p0 = pneg %p442_p11  ;;  %p448_p13 = scmp.lt.s32.totalorder %s446_s7, %s440_s30 }
  0x42   : > { %p449_p3 = por %p448_p13, %p447_p7 }
  0x44   : > { %p450_p6 = pnand %p449_p3, %p443_p0 }
  0xc8   : > { %v207_v2 = vpop.xlane.xlu0 %206 }
  0xc9   : > { %v209_v3 = vmul.f32 0.0078125, %v207_v2 }
  0xcb   : > { %v210_v4 = vsub.f32 %v203_v0, %v209_v3 }
  0xcd   : > { %v211_v5 = vmul.f32 %v210_v4, %v210_v4 }
  0xcf   : > { %v212_v6 = vsel %vm204_vm0, %v211_v5, 0.0 }
  0xd0   : > { %213 = vadd.xlane.f32.xlu0 %v212_v6 }
 0x15d   : > { %v214_v7 = vpop.xlane.xlu0 %213 }
 0x15e   : > { %v215_v8 = vmul.f32 0.0078125, %v214_v7 }
 0x160   : > { %v216_v9 = vadd.f32 1e-12, %v215_v8 }
 0x162   : > { %408 = vrsqrt.f32 %v216_v9 }
 0x16c   : > { %v409_v10 = vpop.eup %408 }
 0x16d   : > { %v218_v12 = vmul.f32 %v409_v10, %v210_v4 }
 0x16f   : > { %v226_v14 = vmul.f32 %v340_v11, %v218_v12 }
 0x171   : > { %v234_v15 = vadd.f32 %v341_v13, %v226_v14 }
 0x173   : > { %235 = vst [vmem:[%s202_s19] sm:$0xf] %v234_v15 }
 0x174   : > { %453 = shalt.err (!%p450_p6)
}
 0x175   : > { %s454_s5 = scalar_lea.hbm %s675_s28, 64  ;;  %s458_s24 = scalar_lea.hbm %s727_s3, 128 }
 0x176   : > { %p455_p4 = scmp.ne.s32.totalorder %s675_s28, %s454_s5  ;;  %p459_p1 = scmp.lt.u32.totalorder %s675_s28, %s727_s3 }
 0x177   : > { %p460_p2 = scmp.lt.u32.totalorder %s458_s24, %s454_s5  ;;  %p462_p8 = scmp.lt.u32.totalorder %s454_s5, %s675_s28 }
 0x178   : > { %p456_p10 = pnand %p455_p4, %p736_p9 }
 0x179   : > { %p461_p5 = por %p460_p2, %p459_p1 }
 0x17a   : > { %p457_p12 = pneg %p456_p10 }
 0x17b   : > { %p463_p11 = por %p462_p8, %p461_p5 }
 0x17d   : > { %p464_p0 = pnand %p463_p11, %p457_p12 }
 0x17f   : > { %467 = shalt.err (!%p464_p0)
}
 0x180   : > { %348 = dma.vmem_to_hbm [thread:$0]  (%p736_p9), %s677_s21, 64, %s675_s28, %s237_s29  }
 0x181 PF: > { %s263_s9 = sand.u32 1, %s502_s12   ;;  %p737_p7 = scmp.ne.s32.totalorder %s732_s27, 0 }
 0x182   : > { %p738_p13 = scmp.ge.s32.totalorder %s522_s17, 2  ;;  %s264_s10 = scalar_lea.sflag [#allocation4], %s263_s9 }
 0x184   : > { %p355_p3 = pnand %p738_p13, %p737_p7 }
 0x186   : > { %497 = dma.done.wait (!%p355_p3), %s264_s10, 64  }
 0x187   : > { %499 = vsyncadd (!%p355_p3), %s264_s10, 4294967232  ;;  %s19_s17 = sadd.s32 1, %s522_s17   ;;  %s739_s12 = smov %s506_s13 }
 0x188   : > { %p16_p6 = scmp.ge.s32.totalorder %s19_s17, 4   ;;  %s740_s13 = smov %s510_s14 }
 0x189   : > { %s741_s14 = smov %s602_s26  ;;  %s742_s15 = smov %s518_s16 }
 0x18a   : > { %s743_s16 = smov %s745_s20  ;;  %18 = sbr.rel (!%p16_p6) target bundleno = 6 (0x6), region = 77 }
 0x191   :  { %269 = vsyncpa [#allocation3], 1 }
 0x192   :  { %271 = vsyncpa [#allocation3 + $0x1], 1 }
 0x193   :  { %272 = vsyncpa [#allocation4], 1 }
 0x194   :  { %274 = vsyncpa [#allocation4 + $0x1], 1 }

</bundles_post_ra>
